<compile_context>
chip_gen: v6e
topology: v6e:2x2x1
jax: 0.10.0
libtpu: 0.0.40
codegen_flags: <defaults>
</compile_context>

<pallas_src>
import functools

import jax
import jax.numpy as jnp
from jax import lax
from jax.experimental import pallas as pl
from jax.experimental.pallas import tpu as pltpu


# ----------------------------- kernel helpers -------------------------------

def _self_mask(tm, n):
    """Self-contrast mask for this row tile as a (TM,1)==(1,N) broadcast compare
    (no full (TM,N) int32 iota planes)."""
    row_start = pl.program_id(0) * tm
    row_ids = lax.broadcasted_iota(jnp.int32, (tm, 1), 0) + row_start   # (TM, 1)
    col_ids = lax.broadcasted_iota(jnp.int32, (1, n), 1)                # (1,  N)
    return row_ids == col_ids                                           # (TM, N) bool


def _scaled_dot(a_ref, c_ref, inv_temp):
    """anchor . contrast^T with 1/T folded into the (TM, D) anchor tile.

    dot_general contracts dim 1 of BOTH operands (no XLU transpose); the MXU
    accumulates in f32 regardless of input dtype (f32 or bf16 features)."""
    a = a_ref[...]
    a = (a.astype(jnp.float32) * inv_temp).astype(a.dtype)
    return lax.dot_general(
        a, c_ref[...],
        dimension_numbers=(((1,), (1,)), ((), ())),
        preferred_element_type=jnp.float32)                             # (TM, N) f32


def _row_log_z(adc, is_self, exp_in_bf16):
    """Per-row max and log of the non-self softmax denominator (stable)."""
    logits_max = jnp.max(adc, axis=1, keepdims=True)                    # (TM, 1)
    shifted = adc - logits_max
    if exp_in_bf16:
        # v6e/v7x EUP bf16 path (~2x transcendental throughput);
        # ~2^-8 relative error per exp flows into log Z.
        e = jnp.exp(shifted.astype(jnp.bfloat16)).astype(jnp.float32)
    else:
        e = jnp.exp(shifted)
    z = jnp.sum(jnp.where(is_self, 0.0, e), axis=1, keepdims=True)      # (TM, 1)
    return logits_max, jnp.log(z)


# -------------------------------- kernels ------------------------------------

def _supcon_labels_kernel(inv_temp, exp_in_bf16,
                          a_ref, c_ref, lrow_ref, lcol_ref, out_ref):
    """Labels / SimCLR path: positive mask rebuilt in-kernel from label vectors
    via a boolean broadcast compare (no N x N mask in HBM, no float pmask)."""
    adc = _scaled_dot(a_ref, c_ref, inv_temp)                           # (TM, N)
    tm, n = adc.shape
    is_self = _self_mask(tm, n)
    logits_max, log_z = _row_log_z(adc, is_self, exp_in_bf16)

    same = lrow_ref[...] == lcol_ref[...]                               # (TM,1)==(1,N) -> (TM,N) bool
    pos = jnp.logical_and(same, jnp.logical_not(is_self))
    pos_adc = jnp.sum(jnp.where(pos, adc, 0.0), axis=1, keepdims=True)  # (TM, 1)
    n_pos = jnp.sum(jnp.where(pos, 1.0, 0.0), axis=1, keepdims=True)    # (TM, 1)

    # sum(mask * log_prob) == sum(mask * adc) - (logits_max + log Z) * n_pos
    # NOTE: rows with zero positives give NaN, same as the PyTorch reference.
    out_ref[...] = -(pos_adc - (logits_max + log_z) * n_pos) / n_pos    # (TM, 1)


def _supcon_mask_kernel(inv_temp, exp_in_bf16,
                        a_ref, c_ref, m_ref, out_ref):
    """Explicit (possibly asymmetric / weighted) user-supplied mask path.
    Mask arrives as bf16 (0/1 exact) and is upcast in-kernel."""
    adc = _scaled_dot(a_ref, c_ref, inv_temp)
    tm, n = adc.shape
    is_self = _self_mask(tm, n)
    logits_max, log_z = _row_log_z(adc, is_self, exp_in_bf16)

    pmask = jnp.where(is_self, 0.0, m_ref[...].astype(jnp.float32))     # (TM, N)
    pos_adc = jnp.sum(pmask * adc, axis=1, keepdims=True)
    n_pos = jnp.sum(pmask, axis=1, keepdims=True)

    out_ref[...] = -(pos_adc - (logits_max + log_z) * n_pos) / n_pos


# ------------------------------ tiling logic ---------------------------------

def _vmem_capacity_bytes():
    """Generation-aware VMEM capacity (64 MiB on v7x, 128 MiB on v5e/v6e)."""
    try:
        info = pltpu.get_tpu_info()
        cap = getattr(info, "vmem_capacity_bytes", None)
        if cap:
            return int(cap)
    except Exception:
        pass
    return 64 * 1024 * 1024     # conservative default (v7x per-TC)


def _pick_block_rows(n, dim, itemsize, mask_path, vmem_cap):
    """Largest row tile (multiple of 8 dividing N, preferring 256+ to fill the
    2x256^2 MXU on v6e/v7x) whose per-step working set fits ~45% of VMEM."""
    resident = n * dim * itemsize + 4 * n              # single-buffered contrast + col labels
    avail = max(4 * 1024 * 1024, int(0.45 * vmem_cap) - resident)
    per_row = 6 * n * 4 + 2 * dim * itemsize + 16      # live f32 [*,N] planes + anchor/label/out rows
    if mask_path:
        per_row += 2 * n * 2                           # bf16 mask tile, double-buffered
    budget_rows = max(8, avail // per_row)
    for tm in (512, 256, 128, 64, 32, 16, 8):
        if tm <= budget_rows and n % tm == 0:
            return tm
    return n   # awkward / tiny N: single full-height tile


# -------------------------------- wrapper -------------------------------------

def supcon_loss(features, labels=None, mask=None, temperature=0.07,
                contrast_mode='all', block_rows=None, exp_in_bf16=False):
    """Pallas-backed SupConLoss forward (matches PyTorch reference semantics)."""
    if features.ndim < 3:
        raise ValueError('`features` needs to be [bsz, n_views, ...]')
    if features.ndim > 3:
        features = features.reshape(features.shape[0], features.shape[1], -1)
    bsz, n_views, dim = features.shape

    if contrast_mode == 'one':
        # TODO(synk): contrast_mode='one' (anchor = first view only) not wired in.
        raise NotImplementedError("contrast_mode='one' not implemented")
    if contrast_mode != 'all':
        raise ValueError('Unknown mode: {}'.format(contrast_mode))
    if labels is not None and mask is not None:
        raise ValueError('Cannot define both `labels` and `mask`')

    n_total = bsz * n_views
    # torch.cat(torch.unbind(features, 1), 0): view-major row ordering.
    contrast_feature = jnp.transpose(features, (1, 0, 2)).reshape(n_total, dim)

    itemsize = jnp.dtype(features.dtype).itemsize
    vmem_cap = _vmem_capacity_bytes()
    tm = (int(block_rows) if block_rows is not None
          else _pick_block_rows(n_total, dim, itemsize, mask is not None, vmem_cap))
    if n_total % tm != 0:
        raise ValueError('block_rows must divide bsz * n_views')
    grid = (n_total // tm,)
    inv_temp = 1.0 / float(temperature)

    if mask is None:
        if labels is None:
            base_labels = jnp.arange(bsz, dtype=jnp.int32)            # SimCLR: identity
        else:
            labels = jnp.asarray(labels).reshape(-1)
            if labels.shape[0] != bsz:
                raise ValueError('Num of labels does not match num of features')
            base_labels = labels.astype(jnp.int32)
        lab_ext = jnp.tile(base_labels, n_views)                      # length N, view-major
        operands = (contrast_feature, contrast_feature,
                    lab_ext.reshape(n_total, 1), lab_ext.reshape(1, n_total))
        kernel = functools.partial(_supcon_labels_kernel, inv_temp, bool(exp_in_bf16))

        def make_in_specs(single_buffer_resident):
            kw = ({'pipeline_mode': pl.Buffered(1)} if single_buffer_resident else {})
            return [
                pl.BlockSpec((tm, dim), lambda i: (i, 0)),            # anchor row tile
                pl.BlockSpec((n_total, dim), lambda i: (0, 0), **kw), # contrast (resident)
                pl.BlockSpec((tm, 1), lambda i: (i, 0)),              # row labels
                pl.BlockSpec((1, n_total), lambda i: (0, 0), **kw),   # col labels (resident)
            ]
        extra_vmem = 0
    else:
        # Arbitrary (possibly asymmetric / weighted) user mask: tile it and stream
        # row blocks.  0/1 values are exact in bf16 -> half the HBM traffic.
        base_mask = jnp.asarray(mask, dtype=jnp.float32)
        tiled_mask = jnp.tile(base_mask, (n_views, n_views)).astype(jnp.bfloat16)
        operands = (contrast_feature, contrast_feature, tiled_mask)
        kernel = functools.partial(_supcon_mask_kernel, inv_temp, bool(exp_in_bf16))

        def make_in_specs(single_buffer_resident):
            kw = ({'pipeline_mode': pl.Buffered(1)} if single_buffer_resident else {})
            return [
                pl.BlockSpec((tm, dim), lambda i: (i, 0)),
                pl.BlockSpec((n_total, dim), lambda i: (0, 0), **kw),
                pl.BlockSpec((tm, n_total), lambda i: (i, 0)),        # bf16 mask tile
            ]
        extra_vmem = 2 * tm * n_total * 2

    # Working-set estimate (resident counted at 2x so the no-Buffered(1) fallback
    # also fits) with headroom, capped generation-aware at 87.5% of VMEM.
    est = (2 * n_total * dim * itemsize          # contrast features
           + 2 * tm * dim * itemsize             # anchor row tiles (double-buffered)
           + 6 * tm * n_total * 4                # live f32 [TM,N] intermediates
           + 8 * n_total + 8 * tm                # label vectors / output tile
           + extra_vmem)
    vmem_limit = int(min(int(0.875 * vmem_cap),
                         max(16 * 1024 * 1024, int(1.5 * est))))

    def run(single_buffer_resident):
        return pl.pallas_call(
            kernel,
            out_shape=jax.ShapeDtypeStruct((n_total, 1), jnp.float32),
            grid_spec=pltpu.PrefetchScalarGridSpec(
                num_scalar_prefetch=0,
                grid=grid,
                in_specs=make_in_specs(single_buffer_resident),
                out_specs=pl.BlockSpec((tm, 1), lambda i: (i, 0)),
            ),
            compiler_params=pltpu.CompilerParams(
                dimension_semantics=("parallel",),   # shard row tiles across TCs (v7x)
                vmem_limit_bytes=vmem_limit),
        )(*operands)

    try:
        per_anchor = run(True)      # Buffered(1) on constant-index resident blocks
    except Exception:
        per_anchor = run(False)     # fallback: default double-buffering

    # loss.view(anchor_count, batch_size).mean() == mean over all N anchors.
    return jnp.mean(per_anchor)


# ------------------------------ pure-JAX reference ----------------------------

def _supcon_loss_ref(features, labels=None, mask=None, temperature=0.07):
    """Pure-JAX reference mirroring the PyTorch module (contrast_mode='all')."""
    bsz, n_views, _ = features.shape
    if mask is None:
        if labels is None:
            base_mask = jnp.eye(bsz, dtype=jnp.float32)
        else:
            lab = labels.reshape(-1, 1)
            base_mask = (lab == lab.T).astype(jnp.float32)
    else:
        base_mask = mask.astype(jnp.float32)
    n = bsz * n_views
    cf = jnp.transpose(features, (1, 0, 2)).reshape(n, -1).astype(jnp.float32)
    adc = (cf @ cf.T) / temperature
    logits = adc - jnp.max(adc, axis=1, keepdims=True)
    logits_mask = 1.0 - jnp.eye(n, dtype=jnp.float32)
    m = jnp.tile(base_mask, (n_views, n_views)) * logits_mask
    exp_logits = jnp.exp(logits) * logits_mask
    log_prob = logits - jnp.log(jnp.sum(exp_logits, axis=1, keepdims=True))
    mlpp = jnp.sum(m * log_prob, axis=1) / jnp.sum(m, axis=1)
    return jnp.mean(-mlpp)


if __name__ == "__main__":
    key = jax.random.PRNGKey(0)
    kf, kl = jax.random.split(key)

    bsz, n_views, dim = 8, 2, 32
    features = jax.random.normal(kf, (bsz, n_views, dim), dtype=jnp.float32)
    features = features / jnp.linalg.norm(features, axis=-1, keepdims=True)
    labels = jax.random.randint(kl, (bsz,), 0, 3)

    tol = dict(rtol=1e-3, atol=1e-3)

    # 1) supervised labels, auto row tile
    loss = jax.block_until_ready(supcon_loss(features, labels=labels, temperature=0.07))
    ref = _supcon_loss_ref(features, labels=labels, temperature=0.07)
    assert jnp.allclose(loss, ref, **tol), ("labels/auto", loss, ref)

    # 2) supervised labels, forced multi-tile grid (2 row tiles of 8)
    loss = jax.block_until_ready(
        supcon_loss(features, labels=labels, temperature=0.07, block_rows=8))
    assert jnp.allclose(loss, ref, **tol), ("labels/tiled", loss, ref)

    # 3) SimCLR path (labels=None, mask=None)
    loss = jax.block_until_ready(supcon_loss(features, temperature=0.07, block_rows=8))
    ref0 = _supcon_loss_ref(features, temperature=0.07)
    assert jnp.allclose(loss, ref0, **tol), ("simclr", loss, ref0)

    # 4) explicit (asymmetric) user mask path (bf16 mask transport in-kernel upcast)
    user_mask = (labels.reshape(-1, 1) == labels.reshape(1, -1)).astype(jnp.float32)
    user_mask = user_mask.at[0, 3].set(1.0)
    loss = jax.block_until_ready(
        supcon_loss(features, mask=user_mask, temperature=0.07, block_rows=8))
    refm = _supcon_loss_ref(features, mask=user_mask, temperature=0.07)
    assert jnp.allclose(loss, refm, **tol), ("mask", loss, refm)

    # 5) bf16 features (half the DMA / MXU input bytes), f32 accumulation in-kernel
    f_bf16 = features.astype(jnp.bfloat16)
    loss = jax.block_until_ready(
        supcon_loss(f_bf16, labels=labels, temperature=0.07))
    ref_q = _supcon_loss_ref(f_bf16.astype(jnp.float32), labels=labels, temperature=0.07)
    assert jnp.allclose(loss, ref_q, rtol=2e-2, atol=2e-2), ("bf16", loss, ref_q)

    # 6) optional bf16-exp EUP path (v6e/v7x), looser tolerance
    loss = jax.block_until_ready(
        supcon_loss(features, labels=labels, temperature=0.07, exp_in_bf16=True))
    assert jnp.allclose(loss, ref, rtol=2e-2, atol=2e-2), ("bf16-exp", loss, ref)

    print("KERNEL_OK")
</pallas_src>

<mosaic_0001>
module attributes {stable_mosaic.version = 11 : i64} {
  func.func @_supcon_labels_kernel(%arg0: i32, %arg1: memref<16x32xf32, #tpu.memory_space<vmem>>, %arg2: memref<16x32xf32, #tpu.memory_space<vmem>>, %arg3: memref<16x1xi32, #tpu.memory_space<vmem>>, %arg4: memref<1x16xi32, #tpu.memory_space<vmem>>, %arg5: memref<16x1xf32, #tpu.memory_space<vmem>>) attributes {dimension_semantics = [#tpu.dimension_semantics<parallel>], iteration_bounds = array<i64: 1>, scalar_prefetch = 0 : i64, scratch_operands = 0 : i64, tpu.core_type = #tpu.core_type<tc>, window_params = [{transform_indices = @transform_0, window_bounds = array<i64: 16, 32>}, {pipeline_mode = #tpu.pipeline_mode<synchronous>, transform_indices = @transform_1, window_bounds = array<i64: 16, 32>}, {transform_indices = @transform_2, window_bounds = array<i64: 16, 1>}, {pipeline_mode = #tpu.pipeline_mode<synchronous>, transform_indices = @transform_3, window_bounds = array<i64: 1, 16>}, {transform_indices = @transform_4, window_bounds = array<i64: 16, 1>}]} {
    %c0 = arith.constant 0 : index
    %c0_0 = arith.constant 0 : index
    %0 = vector.load %arg1[%c0, %c0_0] : memref<16x32xf32, #tpu.memory_space<vmem>>, vector<16x32xf32>
    %cst = arith.constant 14.2857141 : f32
    %1 = vector.broadcast %cst : f32 to vector<16x32xf32>
    %2 = arith.mulf %0, %1 : vector<16x32xf32>
    %c0_1 = arith.constant 0 : index
    %c0_2 = arith.constant 0 : index
    %3 = vector.load %arg2[%c0_1, %c0_2] : memref<16x32xf32, #tpu.memory_space<vmem>>, vector<16x32xf32>
    %cst_3 = arith.constant dense<0.000000e+00> : vector<16x16xf32>
    %4 = tpu.matmul %2, %3, %cst_3 {dimension_numbers = #tpu.dot_dimension_numbers<[1], [1], [0], [0], [0, 0, 1, 0], [], []>} : vector<16x32xf32>, vector<16x32xf32>, vector<16x16xf32> -> vector<16x16xf32>
    %c16_i32 = arith.constant 16 : i32
    %5 = arith.muli %arg0, %c16_i32 : i32
    %6 = tpu.iota {dimensions = array<i32: 0>} : vector<16x1xi32>
    %7 = vector.broadcast %5 : i32 to vector<16x1xi32>
    %8 = arith.addi %6, %7 : vector<16x1xi32>
    %9 = tpu.iota {dimensions = array<i32: 1>} : vector<1x16xi32>
    %10 = vector.broadcast %8 : vector<16x1xi32> to vector<16x16xi32>
    %11 = vector.broadcast %9 : vector<1x16xi32> to vector<16x16xi32>
    %12 = arith.cmpi eq, %10, %11 : vector<16x16xi32>
    %cst_4 = arith.constant dense<0xFF800000> : vector<16xf32>
    %13 = vector.multi_reduction <maximumf>, %4, %cst_4 [1] : vector<16x16xf32> to vector<16xf32>
    %14 = vector.shape_cast %13 : vector<16xf32> to vector<16x1xf32>
    %15 = vector.broadcast %14 : vector<16x1xf32> to vector<16x16xf32>
    %16 = arith.subf %4, %15 : vector<16x16xf32>
    %17 = math.exp %16 : vector<16x16xf32>
    %cst_5 = arith.constant 0.000000e+00 : f32
    %18 = vector.broadcast %cst_5 : f32 to vector<16x16xf32>
    %19 = arith.select %12, %18, %17 : vector<16x16xi1>, vector<16x16xf32>
    %cst_6 = arith.constant dense<0.000000e+00> : vector<16xf32>
    %20 = vector.multi_reduction <add>, %19, %cst_6 [1] : vector<16x16xf32> to vector<16xf32>
    %21 = vector.shape_cast %20 : vector<16xf32> to vector<16x1xf32>
    %22 = math.log %21 : vector<16x1xf32>
    %c0_7 = arith.constant 0 : index
    %c0_8 = arith.constant 0 : index
    %23 = vector.load %arg3[%c0_7, %c0_8] : memref<16x1xi32, #tpu.memory_space<vmem>>, vector<16x1xi32>
    %c0_9 = arith.constant 0 : index
    %c0_10 = arith.constant 0 : index
    %24 = vector.load %arg4[%c0_9, %c0_10] : memref<1x16xi32, #tpu.memory_space<vmem>>, vector<1x16xi32>
    %25 = vector.broadcast %23 : vector<16x1xi32> to vector<16x16xi32>
    %26 = vector.broadcast %24 : vector<1x16xi32> to vector<16x16xi32>
    %27 = arith.cmpi eq, %25, %26 : vector<16x16xi32>
    %cst_11 = arith.constant dense<true> : vector<16x16xi1>
    %28 = arith.xori %12, %cst_11 : vector<16x16xi1>
    %29 = arith.andi %27, %28 : vector<16x16xi1>
    %cst_12 = arith.constant 0.000000e+00 : f32
    %30 = vector.broadcast %cst_12 : f32 to vector<16x16xf32>
    %31 = arith.select %29, %4, %30 : vector<16x16xi1>, vector<16x16xf32>
    %cst_13 = arith.constant dense<0.000000e+00> : vector<16xf32>
    %32 = vector.multi_reduction <add>, %31, %cst_13 [1] : vector<16x16xf32> to vector<16xf32>
    %33 = vector.shape_cast %32 : vector<16xf32> to vector<16x1xf32>
    %cst_14 = arith.constant 1.000000e+00 : f32
    %cst_15 = arith.constant 0.000000e+00 : f32
    %34 = vector.broadcast %cst_14 : f32 to vector<16x16xf32>
    %35 = vector.broadcast %cst_15 : f32 to vector<16x16xf32>
    %36 = arith.select %29, %34, %35 : vector<16x16xi1>, vector<16x16xf32>
    %cst_16 = arith.constant dense<0.000000e+00> : vector<16xf32>
    %37 = vector.multi_reduction <add>, %36, %cst_16 [1] : vector<16x16xf32> to vector<16xf32>
    %38 = vector.shape_cast %37 : vector<16xf32> to vector<16x1xf32>
    %39 = arith.addf %14, %22 : vector<16x1xf32>
    %40 = arith.mulf %39, %38 : vector<16x1xf32>
    %41 = arith.subf %33, %40 : vector<16x1xf32>
    %cst_17 = arith.constant 0.000000e+00 : f32
    %42 = vector.broadcast %cst_17 : f32 to vector<16x1xf32>
    %43 = arith.subf %42, %41 : vector<16x1xf32>
    %44 = arith.divf %43, %38 : vector<16x1xf32>
    %c0_18 = arith.constant 0 : index
    %c0_19 = arith.constant 0 : index
    %45 = vector.load %arg5[%c0_18, %c0_19] : memref<16x1xf32, #tpu.memory_space<vmem>>, vector<16x1xf32>
    tpu.vector_store %arg5[%c0_18, %c0_19], %44 {strides = array<i32>} : memref<16x1xf32, #tpu.memory_space<vmem>>, vector<16x1xf32>,
    return
  }
  func.func @transform_0(%arg0: i32) -> (i32, i32) {
    %c0_i32 = arith.constant 0 : i32
    %c0_i32_0 = arith.constant 0 : i32
    return %arg0, %c0_i32 : i32, i32
  }
  func.func @transform_1(%arg0: i32) -> (i32, i32) {
    %c0_i32 = arith.constant 0 : i32
    %c0_i32_0 = arith.constant 0 : i32
    %c0_i32_1 = arith.constant 0 : i32
    return %c0_i32, %c0_i32_0 : i32, i32
  }
  func.func @transform_2(%arg0: i32) -> (i32, i32) {
    %c0_i32 = arith.constant 0 : i32
    %c0_i32_0 = arith.constant 0 : i32
    return %arg0, %c0_i32 : i32, i32
  }
  func.func @transform_3(%arg0: i32) -> (i32, i32) {
    %c0_i32 = arith.constant 0 : i32
    %c0_i32_0 = arith.constant 0 : i32
    %c0_i32_1 = arith.constant 0 : i32
    return %c0_i32, %c0_i32_0 : i32, i32
  }
  func.func @transform_4(%arg0: i32) -> (i32, i32) {
    %c0_i32 = arith.constant 0 : i32
    %c0_i32_0 = arith.constant 0 : i32
    return %arg0, %c0_i32 : i32, i32
  }
}

module attributes {stable_mosaic.version = 11 : i64} {
  func.func @_supcon_labels_kernel(%arg0: i32, %arg1: memref<16x32xf32, #tpu.memory_space<vmem>>, %arg2: memref<16x32xf32, #tpu.memory_space<vmem>>, %arg3: memref<16x1xi32, #tpu.memory_space<vmem>>, %arg4: memref<1x16xi32, #tpu.memory_space<vmem>>, %arg5: memref<16x1xf32, #tpu.memory_space<vmem>>) attributes {dimension_semantics = [#tpu.dimension_semantics<parallel>], iteration_bounds = array<i64: 1>, scalar_prefetch = 0 : i64, scratch_operands = 0 : i64, tpu.core_type = #tpu.core_type<tc>, window_params = [{transform_indices = @transform_0, window_bounds = array<i64: 16, 32>}, {pipeline_mode = #tpu.pipeline_mode<synchronous>, transform_indices = @transform_1, window_bounds = array<i64: 16, 32>}, {transform_indices = @transform_2, window_bounds = array<i64: 16, 1>}, {pipeline_mode = #tpu.pipeline_mode<synchronous>, transform_indices = @transform_3, window_bounds = array<i64: 1, 16>}, {transform_indices = @transform_4, window_bounds = array<i64: 16, 1>}]} {
    %c0 = arith.constant 0 : index
    %c0_0 = arith.constant 0 : index
    %0 = vector.load %arg1[%c0, %c0_0] : memref<16x32xf32, #tpu.memory_space<vmem>>, vector<16x32xf32>
    %cst = arith.constant 14.2857141 : f32
    %1 = vector.broadcast %cst : f32 to vector<16x32xf32>
    %2 = arith.mulf %0, %1 : vector<16x32xf32>
    %c0_1 = arith.constant 0 : index
    %c0_2 = arith.constant 0 : index
    %3 = vector.load %arg2[%c0_1, %c0_2] : memref<16x32xf32, #tpu.memory_space<vmem>>, vector<16x32xf32>
    %cst_3 = arith.constant dense<0.000000e+00> : vector<16x16xf32>
    %4 = tpu.matmul %2, %3, %cst_3 {dimension_numbers = #tpu.dot_dimension_numbers<[1], [1], [0], [0], [0, 0, 1, 0], [], []>} : vector<16x32xf32>, vector<16x32xf32>, vector<16x16xf32> -> vector<16x16xf32>
    %c16_i32 = arith.constant 16 : i32
    %5 = arith.muli %arg0, %c16_i32 : i32
    %6 = tpu.iota {dimensions = array<i32: 0>} : vector<16x1xi32>
    %7 = vector.broadcast %5 : i32 to vector<16x1xi32>
    %8 = arith.addi %6, %7 : vector<16x1xi32>
    %9 = tpu.iota {dimensions = array<i32: 1>} : vector<1x16xi32>
    %10 = vector.broadcast %8 : vector<16x1xi32> to vector<16x16xi32>
    %11 = vector.broadcast %9 : vector<1x16xi32> to vector<16x16xi32>
    %12 = arith.cmpi eq, %10, %11 : vector<16x16xi32>
    %cst_4 = arith.constant dense<0xFF800000> : vector<16xf32>
    %13 = vector.multi_reduction <maximumf>, %4, %cst_4 [1] : vector<16x16xf32> to vector<16xf32>
    %14 = vector.shape_cast %13 : vector<16xf32> to vector<16x1xf32>
    %15 = vector.broadcast %14 : vector<16x1xf32> to vector<16x16xf32>
    %16 = arith.subf %4, %15 : vector<16x16xf32>
    %17 = math.exp %16 : vector<16x16xf32>
    %cst_5 = arith.constant 0.000000e+00 : f32
    %18 = vector.broadcast %cst_5 : f32 to vector<16x16xf32>
    %19 = arith.select %12, %18, %17 : vector<16x16xi1>, vector<16x16xf32>
    %cst_6 = arith.constant dense<0.000000e+00> : vector<16xf32>
    %20 = vector.multi_reduction <add>, %19, %cst_6 [1] : vector<16x16xf32> to vector<16xf32>
    %21 = vector.shape_cast %20 : vector<16xf32> to vector<16x1xf32>
    %22 = math.log %21 : vector<16x1xf32>
    %c0_7 = arith.constant 0 : index
    %c0_8 = arith.constant 0 : index
    %23 = vector.load %arg3[%c0_7, %c0_8] : memref<16x1xi32, #tpu.memory_space<vmem>>, vector<16x1xi32>
    %c0_9 = arith.constant 0 : index
    %c0_10 = arith.constant 0 : index
    %24 = vector.load %arg4[%c0_9, %c0_10] : memref<1x16xi32, #tpu.memory_space<vmem>>, vector<1x16xi32>
    %25 = vector.broadcast %23 : vector<16x1xi32> to vector<16x16xi32>
    %26 = vector.broadcast %24 : vector<1x16xi32> to vector<16x16xi32>
    %27 = arith.cmpi eq, %25, %26 : vector<16x16xi32>
    %cst_11 = arith.constant dense<true> : vector<16x16xi1>
    %28 = arith.xori %12, %cst_11 : vector<16x16xi1>
    %29 = arith.andi %27, %28 : vector<16x16xi1>
    %cst_12 = arith.constant 0.000000e+00 : f32
    %30 = vector.broadcast %cst_12 : f32 to vector<16x16xf32>
    %31 = arith.select %29, %4, %30 : vector<16x16xi1>, vector<16x16xf32>
    %cst_13 = arith.constant dense<0.000000e+00> : vector<16xf32>
    %32 = vector.multi_reduction <add>, %31, %cst_13 [1] : vector<16x16xf32> to vector<16xf32>
    %33 = vector.shape_cast %32 : vector<16xf32> to vector<16x1xf32>
    %cst_14 = arith.constant 1.000000e+00 : f32
    %cst_15 = arith.constant 0.000000e+00 : f32
    %34 = vector.broadcast %cst_14 : f32 to vector<16x16xf32>
    %35 = vector.broadcast %cst_15 : f32 to vector<16x16xf32>
    %36 = arith.select %29, %34, %35 : vector<16x16xi1>, vector<16x16xf32>
    %cst_16 = arith.constant dense<0.000000e+00> : vector<16xf32>
    %37 = vector.multi_reduction <add>, %36, %cst_16 [1] : vector<16x16xf32> to vector<16xf32>
    %38 = vector.shape_cast %37 : vector<16xf32> to vector<16x1xf32>
    %39 = arith.addf %14, %22 : vector<16x1xf32>
    %40 = arith.mulf %39, %38 : vector<16x1xf32>
    %41 = arith.subf %33, %40 : vector<16x1xf32>
    %cst_17 = arith.constant 0.000000e+00 : f32
    %42 = vector.broadcast %cst_17 : f32 to vector<16x1xf32>
    %43 = arith.subf %42, %41 : vector<16x1xf32>
    %44 = arith.divf %43, %38 : vector<16x1xf32>
    %c0_18 = arith.constant 0 : index
    %c0_19 = arith.constant 0 : index
    %45 = vector.load %arg5[%c0_18, %c0_19] : memref<16x1xf32, #tpu.memory_space<vmem>>, vector<16x1xf32>
    tpu.vector_store %arg5[%c0_18, %c0_19], %44 {strides = array<i32>} : memref<16x1xf32, #tpu.memory_space<vmem>>, vector<16x1xf32>,
    return
  }
  func.func @transform_0(%arg0: i32) -> (i32, i32) {
    %c0_i32 = arith.constant 0 : i32
    %c0_i32_0 = arith.constant 0 : i32
    return %arg0, %c0_i32 : i32, i32
  }
  func.func @transform_1(%arg0: i32) -> (i32, i32) {
    %c0_i32 = arith.constant 0 : i32
    %c0_i32_0 = arith.constant 0 : i32
    %c0_i32_1 = arith.constant 0 : i32
    return %c0_i32, %c0_i32_0 : i32, i32
  }
  func.func @transform_2(%arg0: i32) -> (i32, i32) {
    %c0_i32 = arith.constant 0 : i32
    %c0_i32_0 = arith.constant 0 : i32
    return %arg0, %c0_i32 : i32, i32
  }
  func.func @transform_3(%arg0: i32) -> (i32, i32) {
    %c0_i32 = arith.constant 0 : i32
    %c0_i32_0 = arith.constant 0 : i32
    %c0_i32_1 = arith.constant 0 : i32
    return %c0_i32, %c0_i32_0 : i32, i32
  }
  func.func @transform_4(%arg0: i32) -> (i32, i32) {
    %c0_i32 = arith.constant 0 : i32
    %c0_i32_0 = arith.constant 0 : i32
    return %arg0, %c0_i32 : i32, i32
  }
}

</mosaic_0001>

<bundles_post_ra>
// kernel: tpu_custom_call.1
= control target key start
LH: loop header
LB: loop body
LE: loop exit
PB: predicated region body
PF: predicated region fallthrough
CT: control target
= control target key end

     0   :  { %9 = vsyncpa [#allocation3], 0  ;;  %s274_s15 = smov [#allocation2]   ;;  %s351_s0 = inlined_call_operand.vmem [shape: f32[16,32], index: 0, kind: input, shape index: {}]   ;;  %s352_s1 = inlined_call_operand.hbm [shape: f32[16,32], index: 1, kind: input, shape index: {}]   ;;  %s353_s2 = inlined_call_operand.vmem [shape: s32[16,1], index: 2, kind: input, shape index: {}]   ;;  %s354_s3 = inlined_call_operand.vmem [shape: s32[1,16], index: 3, kind: input, shape index: {}]   ;;  %s355_s4 = inlined_call_operand.vmem [shape: f32[16,1], index: 4, kind: output, shape index: {}]  }
   0x1   :  { %s17_s16 = sshll.u32 %s274_s15, 4  ;;  %s18_s16 = int_to_ptr.vmem [resolvable:$true] %s17_s16 }
   0x2   :  { %s260_s17 = scalar_lea.vmem %s18_s16, 256  ;;  %p265_p1 = scmp.lt.s32.totalorder %s18_s16, %s18_s16 }
   0x3   :  { %p261_p0 = scmp.ne.s32.totalorder %s18_s16, %s260_s17  ;;  %p266_p2 = scmp.lt.s32.totalorder %s260_s17, %s260_s17 }
   0x5   :  { %p267_p3 = por %p266_p2, %p265_p1 }
   0x7   :  { %p268_p4 = pnand %p267_p3, %p261_p0 }
   0x9   :  { %271 = shalt.err (!%p268_p4)
}
   0xa   :  { %s275_s18 = smov 128   ;;  %s276_s19 = smov 8  }
   0xb   :  { %23 = dma.hbm_to_vmem [thread:$0]  %s352_s1, 256, %s18_s16, [#allocation3], %s275_s18, %s275_s18, %s276_s19  }
   0xc   :  { %272 = dma.done.wait [#allocation3], 256  }
   0xd   :  { %273 = vsyncadd [#allocation3], 4294967040  ;;  %v277_v0 = vmov 0   ;;  %vm37_vm0 = vcmask 261120   ;;  %v36_v1 = vld [vmem:[#allocation2 + $0x8] sm:$0xff]  ;;  %v35_v2 = vld [vmem:[#allocation2] sm:$0xff]  ;;  %v126_v16 = vlaneseq }
   0xe   :  { %238 = vset.pattern.permute.xlu1 %v277_v0  ;;  %239 = vset.pattern.permute.xlu0 %v277_v0  ;;  %v31_v3 = vld [vmem:[%s351_s0] sm:$0xff]  ;;  %v32_v6 = vld [vmem:[%s351_s0 + $0x8] sm:$0xff]  ;;  %vm136_vm1 = vcmask 130048   ;;  %vm278_vm3 = vmmov 1   ;;  %v279_v29 = vmov 0.0   ;;  %vm208_vm11 = vcmask 7168  }
   0xf   :  { %225 = vmatprep.subr.msk.mxu0 %vm37_vm0, %v36_v1  ;;  %v33_v4 = vmul.f32 14.285714, %v31_v3  ;;  %v161_v5 = vld [vmem:[%s353_s2] sm:$0xff]  ;;  %v162_v7 = vld [vmem:[%s353_s2 + $0x8] sm:$0xff]  ;;  %v34_v8 = vmul.f32 14.285714, %v32_v6 }
  0x10   :  { %226 = vmatpush3.xpose.msk.msra.mxu0 %vm37_vm0, %v36_v1  ;;  %165 = vperm.xlu1 %238, %v161_v5   ;;  %v127_v20 = vshrl.u32 %v126_v16, 7  ;;  %v133_v21 = vand.u32 127, %v126_v16  ;;  %v220_v24 = vld [vmem:[%s354_s3] ss:$0 sm:$0xff] }
  0x11   :  { %227 = vmatprep.subr.msk.mxu0 %vm37_vm0, %v35_v2  ;;  %229 = vmatprep.mubr.msk.f32.mxu0 %vm37_vm0, %v33_v4 }
  0x12   :  { %vm134_vm2 = vcmp.eq.s32.totalorder %v127_v20, %v133_v21  ;;  %v128_v23 = vadd.s32 8, %v127_v20 }
  0x13   :  { %vm176_vm4 = vmxor %vm134_vm2, %vm278_vm3 }
  0x14   :  { %228 = vmatpush3.xpose.msk.msra.mxu0 %vm37_vm0, %v35_v2  ;;  %168 = vperm.xlu1 %238, %v162_v7   ;;  %vm135_vm6 = vcmp.eq.s32.totalorder %v128_v23, %v133_v21 }
  0x15   :  { %vm177_vm8 = vmxor %vm135_vm6, %vm278_vm3 }
  0x17   :  { %230 = vmatmul.mubr.msk.f32.vlgmr.msra.gmra.mxu0 %vm37_vm0, %v34_v8 }
  0x8b   :  { %v166_v22 = vpop.permute.xlu1 %165 }
  0x8c   :  { %vm174_vm5 = vcmp.eq.s32.totalorder %v166_v22, %v220_v24 }
  0x8d   :  { %vm331_vm7 = vmand %vm174_vm5, %vm176_vm4 }
  0x8e   :  { %v188_v30 = vsel %vm331_vm7, 1.0, %v279_v29 }
  0x8f   :  { %v169_v25 = vpop.permute.xlu1 %168  ;;  %v190_v33 = vsel %vm136_vm1, %v188_v30, 0.0 }
  0x90   :  { %vm175_vm9 = vcmp.eq.s32.totalorder %v169_v25, %v220_v24 }
  0x91   :  { %vm179_vm10 = vmand %vm175_vm9, %vm177_vm8 }
  0x92   :  { %v189_v35 = vsel %vm179_vm10, 1.0, %v279_v29 }
  0x93   :  { %v193_v37 = vsel %vm136_vm1, %v189_v35, 0.0 }
  0xd7   :  { %v231_v9 = vpop.f32.mrf.mxu0 }
  0xd8   :  { %v140_v12 = vsel %vm136_vm1, %v231_v9, -inf  ;;  %v181_v40 = vsel %vm179_vm10, %v231_v9, 0.0 }
  0xd9   :  { %v116_v10 = vpop.f32.mrf.mxu0  ;;  %v185_v41 = vsel %vm136_vm1, %v181_v40, 0.0 }
  0xda   :  { %v137_v11 = vsel %vm136_vm1, %v116_v10, -inf  ;;  %v180_v38 = vsel %vm331_vm7, %v116_v10, 0.0 }
  0xdb   :  { %138 = vmax.xlane.f32.xlu0 %v137_v11  ;;  %v182_v39 = vsel %vm136_vm1, %v180_v38, 0.0 }
  0xdf   :  { %141 = vmax.xlane.f32.xlu0 %v140_v12 }
 0x164   :  { %v139_v13 = vpop.xlane.xlu0 %138 }
 0x165   :  { %v143_v14 = vsub.f32 %v116_v10, %v139_v13 }
 0x167   :  { %v145_v15 = vmul.f32 1.442695, %v143_v14 }
 0x168   :  { %v142_v17 = vpop.xlane.xlu0 %141 }
 0x169   :  { %240 = vpow2.f32 %v145_v15  ;;  %v144_v18 = vsub.f32 %v231_v9, %v142_v17 }
 0x16b   :  { %v147_v19 = vmul.f32 1.442695, %v144_v18 }
 0x16d   :  { %242 = vpow2.f32 %v147_v19 }
 0x176   :  { %v241_v26 = vpop.eup %240 }
 0x177   :  { %v149_v28 = vsel %vm134_vm2, 0.0, %v241_v26 }
 0x178   :  { %v151_v31 = vsel %vm136_vm1, %v149_v28, 0.0 }
 0x179   :  { %152 = vadd.xlane.f32.xlu0 %v151_v31 }
 0x17a   :  { %v243_v32 = vpop.eup %242 }
 0x17b   :  { %v150_v34 = vsel %vm135_vm6, 0.0, %v243_v32 }
 0x17c   :  { %v154_v36 = vsel %vm136_vm1, %v150_v34, 0.0 }
 0x17d   :  { %191 = vadd.xlane.f32.xlu0 %v190_v33  ;;  %155 = vadd.xlane.f32.xlu1 %v154_v36 }
 0x181   :  { %194 = vadd.xlane.f32.xlu0 %v193_v37 }
 0x185   :  { %183 = vadd.xlane.f32.xlu0 %v182_v39 }
 0x189   :  { %186 = vadd.xlane.f32.xlu0 %v185_v41 }
 0x202   :  { %v153_v42 = vpop.xlane.xlu0 %152 }
 0x203   :  { %244 = vlog2.f32 %v153_v42 }
 0x206   :  { %v156_v43 = vpop.xlane.xlu1 %155  ;;  %v192_v44 = vpop.xlane.xlu0 %191 }
 0x207   :  { %246 = vlog2.f32 %v156_v43 }
 0x208   :  { %248 = vrcp.f32 %v192_v44 }
 0x20a   :  { %v195_v45 = vpop.xlane.xlu0 %194 }
 0x20b   :  { %250 = vrcp.f32 %v195_v45 }
 0x20e   :  { %v184_v50 = vpop.xlane.xlu0 %183 }
 0x210   :  { %v245_v46 = vpop.eup %244 }
 0x211   :  { %v158_v47 = vmul.f32 0.6931472, %v245_v46 }
 0x212   :  { %v187_v58 = vpop.xlane.xlu0 %186 }
 0x213   :  { %v196_v48 = vadd.f32 %v158_v47, %v139_v13 }
 0x214   :  { %v247_v49 = vpop.eup %246 }
 0x215   :  { %v160_v51 = vmul.f32 0.6931472, %v247_v49  ;;  %v198_v52 = vmul.f32 %v196_v48, %v192_v44  ;;  %v249_v55 = vpop.eup %248 }
 0x217   :  { %v197_v53 = vadd.f32 %v160_v51, %v142_v17  ;;  %v200_v54 = vsub.f32 %v184_v50, %v198_v52 }
 0x218   :  { %v251_v62 = vpop.eup %250 }
 0x219   :  { %v199_v56 = vmul.f32 %v197_v53, %v195_v45  ;;  %v202_v57 = vsub.f32 0.0, %v200_v54 }
 0x21b   :  { %v205_v59 = vmul.f32 %v249_v55, %v202_v57  ;;  %v201_v60 = vsub.f32 %v187_v58, %v199_v56 }
 0x21d   :  { %209 = vst.msk [vmem:[%s355_s4] sm:$0xff] %vm208_vm11, %v205_v59  ;;  %v203_v61 = vsub.f32 0.0, %v201_v60 }
 0x21f   :  { %v207_v63 = vmul.f32 %v251_v62, %v203_v61 }
 0x221   :  { %210 = vst.msk [vmem:[%s355_s4 + $0x8] sm:$0xff] %vm208_vm11, %v207_v63 }
 0x222   :  { %215 = vsyncpa [#allocation3], 1 }

// kernel: tpu_custom_call.1
= control target key start
LH: loop header
LB: loop body
LE: loop exit
PB: predicated region body
PF: predicated region fallthrough
CT: control target
= control target key end

     0   :  { %9 = vsyncpa [#allocation3], 0  ;;  %s274_s15 = smov [#allocation2]   ;;  %s351_s0 = inlined_call_operand.vmem [shape: f32[16,32], index: 0, kind: input, shape index: {}]   ;;  %s352_s1 = inlined_call_operand.hbm [shape: f32[16,32], index: 1, kind: input, shape index: {}]   ;;  %s353_s2 = inlined_call_operand.vmem [shape: s32[16,1], index: 2, kind: input, shape index: {}]   ;;  %s354_s3 = inlined_call_operand.vmem [shape: s32[1,16], index: 3, kind: input, shape index: {}]   ;;  %s355_s4 = inlined_call_operand.vmem [shape: f32[16,1], index: 4, kind: output, shape index: {}]  }
   0x1   :  { %s17_s16 = sshll.u32 %s274_s15, 4  ;;  %s18_s16 = int_to_ptr.vmem [resolvable:$true] %s17_s16 }
   0x2   :  { %s260_s17 = scalar_lea.vmem %s18_s16, 256  ;;  %p265_p1 = scmp.lt.s32.totalorder %s18_s16, %s18_s16 }
   0x3   :  { %p261_p0 = scmp.ne.s32.totalorder %s18_s16, %s260_s17  ;;  %p266_p2 = scmp.lt.s32.totalorder %s260_s17, %s260_s17 }
   0x5   :  { %p267_p3 = por %p266_p2, %p265_p1 }
   0x7   :  { %p268_p4 = pnand %p267_p3, %p261_p0 }
   0x9   :  { %271 = shalt.err (!%p268_p4)
}
   0xa   :  { %s275_s18 = smov 128   ;;  %s276_s19 = smov 8  }
   0xb   :  { %23 = dma.hbm_to_vmem [thread:$0]  %s352_s1, 256, %s18_s16, [#allocation3], %s275_s18, %s275_s18, %s276_s19  }
   0xc   :  { %272 = dma.done.wait [#allocation3], 256  }
   0xd   :  { %273 = vsyncadd [#allocation3], 4294967040  ;;  %v277_v0 = vmov 0   ;;  %vm37_vm0 = vcmask 261120   ;;  %v36_v1 = vld [vmem:[#allocation2 + $0x8] sm:$0xff]  ;;  %v35_v2 = vld [vmem:[#allocation2] sm:$0xff]  ;;  %v126_v16 = vlaneseq }
   0xe   :  { %238 = vset.pattern.permute.xlu1 %v277_v0  ;;  %239 = vset.pattern.permute.xlu0 %v277_v0  ;;  %v31_v3 = vld [vmem:[%s351_s0] sm:$0xff]  ;;  %v32_v6 = vld [vmem:[%s351_s0 + $0x8] sm:$0xff]  ;;  %vm136_vm1 = vcmask 130048   ;;  %vm278_vm3 = vmmov 1   ;;  %v279_v29 = vmov 0.0   ;;  %vm208_vm11 = vcmask 7168  }
   0xf   :  { %225 = vmatprep.subr.msk.mxu0 %vm37_vm0, %v36_v1  ;;  %v33_v4 = vmul.f32 14.285714, %v31_v3  ;;  %v161_v5 = vld [vmem:[%s353_s2] sm:$0xff]  ;;  %v162_v7 = vld [vmem:[%s353_s2 + $0x8] sm:$0xff]  ;;  %v34_v8 = vmul.f32 14.285714, %v32_v6 }
  0x10   :  { %226 = vmatpush3.xpose.msk.msra.mxu0 %vm37_vm0, %v36_v1  ;;  %165 = vperm.xlu1 %238, %v161_v5   ;;  %v127_v20 = vshrl.u32 %v126_v16, 7  ;;  %v133_v21 = vand.u32 127, %v126_v16  ;;  %v220_v24 = vld [vmem:[%s354_s3] ss:$0 sm:$0xff] }
  0x11   :  { %227 = vmatprep.subr.msk.mxu0 %vm37_vm0, %v35_v2  ;;  %229 = vmatprep.mubr.msk.f32.mxu0 %vm37_vm0, %v33_v4 }
  0x12   :  { %vm134_vm2 = vcmp.eq.s32.totalorder %v127_v20, %v133_v21  ;;  %v128_v23 = vadd.s32 8, %v127_v20 }
  0x13   :  { %vm176_vm4 = vmxor %vm134_vm2, %vm278_vm3 }
  0x14   :  { %228 = vmatpush3.xpose.msk.msra.mxu0 %vm37_vm0, %v35_v2  ;;  %168 = vperm.xlu1 %238, %v162_v7   ;;  %vm135_vm6 = vcmp.eq.s32.totalorder %v128_v23, %v133_v21 }
  0x15   :  { %vm177_vm8 = vmxor %vm135_vm6, %vm278_vm3 }
  0x17   :  { %230 = vmatmul.mubr.msk.f32.vlgmr.msra.gmra.mxu0 %vm37_vm0, %v34_v8 }
  0x8b   :  { %v166_v22 = vpop.permute.xlu1 %165 }
  0x8c   :  { %vm174_vm5 = vcmp.eq.s32.totalorder %v166_v22, %v220_v24 }
  0x8d   :  { %vm331_vm7 = vmand %vm174_vm5, %vm176_vm4 }
  0x8e   :  { %v188_v30 = vsel %vm331_vm7, 1.0, %v279_v29 }
  0x8f   :  { %v169_v25 = vpop.permute.xlu1 %168  ;;  %v190_v33 = vsel %vm136_vm1, %v188_v30, 0.0 }
  0x90   :  { %vm175_vm9 = vcmp.eq.s32.totalorder %v169_v25, %v220_v24 }
  0x91   :  { %vm179_vm10 = vmand %vm175_vm9, %vm177_vm8 }
  0x92   :  { %v189_v35 = vsel %vm179_vm10, 1.0, %v279_v29 }
  0x93   :  { %v193_v37 = vsel %vm136_vm1, %v189_v35, 0.0 }
  0xd7   :  { %v231_v9 = vpop.f32.mrf.mxu0 }
  0xd8   :  { %v140_v12 = vsel %vm136_vm1, %v231_v9, -inf  ;;  %v181_v40 = vsel %vm179_vm10, %v231_v9, 0.0 }
  0xd9   :  { %v116_v10 = vpop.f32.mrf.mxu0  ;;  %v185_v41 = vsel %vm136_vm1, %v181_v40, 0.0 }
  0xda   :  { %v137_v11 = vsel %vm136_vm1, %v116_v10, -inf  ;;  %v180_v38 = vsel %vm331_vm7, %v116_v10, 0.0 }
  0xdb   :  { %138 = vmax.xlane.f32.xlu0 %v137_v11  ;;  %v182_v39 = vsel %vm136_vm1, %v180_v38, 0.0 }
  0xdf   :  { %141 = vmax.xlane.f32.xlu0 %v140_v12 }
 0x164   :  { %v139_v13 = vpop.xlane.xlu0 %138 }
 0x165   :  { %v143_v14 = vsub.f32 %v116_v10, %v139_v13 }
 0x167   :  { %v145_v15 = vmul.f32 1.442695, %v143_v14 }
 0x168   :  { %v142_v17 = vpop.xlane.xlu0 %141 }
 0x169   :  { %240 = vpow2.f32 %v145_v15  ;;  %v144_v18 = vsub.f32 %v231_v9, %v142_v17 }
 0x16b   :  { %v147_v19 = vmul.f32 1.442695, %v144_v18 }
 0x16d   :  { %242 = vpow2.f32 %v147_v19 }
 0x176   :  { %v241_v26 = vpop.eup %240 }
 0x177   :  { %v149_v28 = vsel %vm134_vm2, 0.0, %v241_v26 }
 0x178   :  { %v151_v31 = vsel %vm136_vm1, %v149_v28, 0.0 }
 0x179   :  { %152 = vadd.xlane.f32.xlu0 %v151_v31 }
 0x17a   :  { %v243_v32 = vpop.eup %242 }
 0x17b   :  { %v150_v34 = vsel %vm135_vm6, 0.0, %v243_v32 }
 0x17c   :  { %v154_v36 = vsel %vm136_vm1, %v150_v34, 0.0 }
 0x17d   :  { %191 = vadd.xlane.f32.xlu0 %v190_v33  ;;  %155 = vadd.xlane.f32.xlu1 %v154_v36 }
 0x181   :  { %194 = vadd.xlane.f32.xlu0 %v193_v37 }
 0x185   :  { %183 = vadd.xlane.f32.xlu0 %v182_v39 }
 0x189   :  { %186 = vadd.xlane.f32.xlu0 %v185_v41 }
 0x202   :  { %v153_v42 = vpop.xlane.xlu0 %152 }
 0x203   :  { %244 = vlog2.f32 %v153_v42 }
 0x206   :  { %v156_v43 = vpop.xlane.xlu1 %155  ;;  %v192_v44 = vpop.xlane.xlu0 %191 }
 0x207   :  { %246 = vlog2.f32 %v156_v43 }
 0x208   :  { %248 = vrcp.f32 %v192_v44 }
 0x20a   :  { %v195_v45 = vpop.xlane.xlu0 %194 }
 0x20b   :  { %250 = vrcp.f32 %v195_v45 }
 0x20e   :  { %v184_v50 = vpop.xlane.xlu0 %183 }
 0x210   :  { %v245_v46 = vpop.eup %244 }
 0x211   :  { %v158_v47 = vmul.f32 0.6931472, %v245_v46 }
 0x212   :  { %v187_v58 = vpop.xlane.xlu0 %186 }
 0x213   :  { %v196_v48 = vadd.f32 %v158_v47, %v139_v13 }
 0x214   :  { %v247_v49 = vpop.eup %246 }
 0x215   :  { %v160_v51 = vmul.f32 0.6931472, %v247_v49  ;;  %v198_v52 = vmul.f32 %v196_v48, %v192_v44  ;;  %v249_v55 = vpop.eup %248 }
 0x217   :  { %v197_v53 = vadd.f32 %v160_v51, %v142_v17  ;;  %v200_v54 = vsub.f32 %v184_v50, %v198_v52 }
 0x218   :  { %v251_v62 = vpop.eup %250 }
 0x219   :  { %v199_v56 = vmul.f32 %v197_v53, %v195_v45  ;;  %v202_v57 = vsub.f32 0.0, %v200_v54 }
 0x21b   :  { %v205_v59 = vmul.f32 %v249_v55, %v202_v57  ;;  %v201_v60 = vsub.f32 %v187_v58, %v199_v56 }
 0x21d   :  { %209 = vst.msk [vmem:[%s355_s4] sm:$0xff] %vm208_vm11, %v205_v59  ;;  %v203_v61 = vsub.f32 0.0, %v201_v60 }
 0x21f   :  { %v207_v63 = vmul.f32 %v251_v62, %v203_v61 }
 0x221   :  { %210 = vst.msk [vmem:[%s355_s4 + $0x8] sm:$0xff] %vm208_vm11, %v207_v63 }
 0x222   :  { %215 = vsyncpa [#allocation3], 1 }

</bundles_post_ra>
